<compile_context>
chip_gen: v5e
topology: v5e:2x2
jax: 0.10.0
libtpu: 0.0.40
codegen_flags: <defaults>
</compile_context>

<pallas_src>
import jax
import jax.numpy as jnp
import numpy as np
from jax.experimental import pallas as pl
from jax.experimental.pallas import tpu as pltpu

EPS = 1e-5  # PyTorch nn.LayerNorm default


def conv_block_kernel(xcol_ref, w_ref, seg_ref, o_ref):
    # xcol_ref: (9*Cin, H*W)   w_ref: (Cout, 9*Cin)
    # seg_ref:  (H*W, H*W)     o_ref: (Cout, H*W)
    # Fused 3x3 conv: one MXU matmul over the 9*Cin contraction dim.
    acc = jnp.dot(w_ref[...], xcol_ref[...],
                  preferred_element_type=jnp.float32)          # (Cout, H*W)

    # LayerNorm over the width dim, done lane-dense via the segment-averaging
    # matrix: (acc @ seg)[:, j] = mean of the W-wide segment containing j.
    seg = seg_ref[...]
    mean = jnp.dot(acc, seg, preferred_element_type=jnp.float32)
    centered = acc - mean
    var = jnp.dot(centered * centered, seg,
                  preferred_element_type=jnp.float32)          # biased variance
    yn = centered * jax.lax.rsqrt(var + EPS)

    # ReLU + lane-dense store (last dim = H*W, multiple of 128 -> unmasked vst).
    o_ref[...] = jnp.maximum(yn, 0.0)


def conv_block_forward(x, w):
    """x: (N, C, H, W) f32 ; w: (Cout, Cin, 3, 3) f32 with Cout == Cin == C."""
    N, C, H, W = x.shape
    HW = H * W

    # --- wrapper-side layout plumbing (XLA) -------------------------------
    xpad = jnp.pad(x, ((0, 0), (0, 0), (1, 1), (1, 1)))
    # im2col: tap-major (kh*3+kw) then channel -> (N, 9*Cin, H*W), lane-dense.
    taps = [xpad[:, :, kh:kh + H, kw:kw + W]
            for kh in range(3) for kw in range(3)]
    xcol = jnp.stack(taps, axis=1).reshape(N, 9 * C, HW)
    # Conv weight repacked to (Cout, 9*Cin) matching xcol's tap-major order.
    w_flat = jnp.transpose(w, (0, 2, 3, 1)).reshape(C, 9 * C)
    # Segment-averaging matrix: seg[i, j] = 1/W if i, j lie in the same W-row.
    ids = jnp.arange(HW) // W
    seg = (ids[:, None] == ids[None, :]).astype(jnp.float32) / W

    out_flat = pl.pallas_call(
        conv_block_kernel,
        out_shape=jax.ShapeDtypeStruct((N, C, HW), jnp.float32),
        grid_spec=pltpu.PrefetchScalarGridSpec(
            num_scalar_prefetch=0,
            grid=(N,),
            in_specs=[
                pl.BlockSpec((None, 9 * C, HW), lambda n: (n, 0, 0)),
                pl.BlockSpec((C, 9 * C), lambda n: (0, 0)),
                pl.BlockSpec((HW, HW), lambda n: (0, 0)),
            ],
            out_specs=pl.BlockSpec((None, C, HW), lambda n: (n, 0, 0)),
        ),
        compiler_params=pltpu.CompilerParams(
            dimension_semantics=("parallel",),
            vmem_limit_bytes=32 * 1024 * 1024,
        ),
    )(xcol, w_flat, seg)

    return out_flat.reshape(N, C, H, W)


def reference_forward(x, w):
    y = jax.lax.conv_general_dilated(
        x, w, window_strides=(1, 1), padding=((1, 1), (1, 1)),
        dimension_numbers=("NCHW", "OIHW", "NCHW"))
    mean = jnp.mean(y, axis=-1, keepdims=True)
    var = jnp.mean((y - mean) ** 2, axis=-1, keepdims=True)
    yn = (y - mean) * jax.lax.rsqrt(var + EPS)
    return jnp.maximum(yn, 0.0)


if __name__ == "__main__":
    key = jax.random.PRNGKey(0)
    kx, kw = jax.random.split(key)

    N, C, H, W = 2, 4, 16, 16
    x = jax.random.normal(kx, (N, C, H, W), dtype=jnp.float32)

    # Deterministic conv weight init (PyTorch-style kaiming-uniform bound).
    fan_in = C * 3 * 3
    bound = 1.0 / np.sqrt(fan_in)
    w = jax.random.uniform(kw, (C, C, 3, 3), dtype=jnp.float32,
                           minval=-bound, maxval=bound)

    out = conv_block_forward(x, w)
    out = jax.block_until_ready(out)

    ref = jax.block_until_ready(reference_forward(x, w))
    np.testing.assert_allclose(np.asarray(out), np.asarray(ref),
                               atol=1e-4, rtol=1e-4)
    print("KERNEL_OK")
</pallas_src>

<mosaic_0001>
module attributes {stable_mosaic.version = 11 : i64} {
  func.func @conv_block_kernel(%arg0: i32, %arg1: memref<1x36x256xf32, #tpu.memory_space<vmem>>, %arg2: memref<4x36xf32, #tpu.memory_space<vmem>>, %arg3: memref<256x256xf32, #tpu.memory_space<vmem>>, %arg4: memref<1x4x256xf32, #tpu.memory_space<vmem>>) attributes {dimension_semantics = [#tpu.dimension_semantics<parallel>], iteration_bounds = array<i64: 2>, scalar_prefetch = 0 : i64, scratch_operands = 0 : i64, tpu.core_type = #tpu.core_type<tc>, window_params = [{transform_indices = @transform_0, window_bounds = array<i64: 1, 36, 256>}, {pipeline_mode = #tpu.pipeline_mode<synchronous>, transform_indices = @transform_1, window_bounds = array<i64: 4, 36>}, {pipeline_mode = #tpu.pipeline_mode<synchronous>, transform_indices = @transform_2, window_bounds = array<i64: 256, 256>}, {transform_indices = @transform_3, window_bounds = array<i64: 1, 4, 256>}]} {
    %c0 = arith.constant 0 : index
    %c0_0 = arith.constant 0 : index
    %0 = vector.load %arg2[%c0, %c0_0] : memref<4x36xf32, #tpu.memory_space<vmem>>, vector<4x36xf32>
    %c0_1 = arith.constant 0 : index
    %c0_2 = arith.constant 0 : index
    %c0_3 = arith.constant 0 : index
    %1 = vector.load %arg1[%c0_1, %c0_2, %c0_3] : memref<1x36x256xf32, #tpu.memory_space<vmem>>, vector<1x36x256xf32>
    %2 = vector.shape_cast %1 : vector<1x36x256xf32> to vector<36x256xf32>
    %cst = arith.constant dense<0.000000e+00> : vector<4x256xf32>
    %3 = tpu.matmul %0, %2, %cst {dimension_numbers = #tpu.dot_dimension_numbers<[1], [0], [0], [1], [0, 0, 1, 1], [], []>} : vector<4x36xf32>, vector<36x256xf32>, vector<4x256xf32> -> vector<4x256xf32>
    %c0_4 = arith.constant 0 : index
    %c0_5 = arith.constant 0 : index
    %4 = vector.load %arg3[%c0_4, %c0_5] : memref<256x256xf32, #tpu.memory_space<vmem>>, vector<256x256xf32>
    %cst_6 = arith.constant dense<0.000000e+00> : vector<4x256xf32>
    %5 = tpu.matmul %3, %4, %cst_6 {dimension_numbers = #tpu.dot_dimension_numbers<[1], [0], [0], [1], [0, 0, 1, 1], [], []>} : vector<4x256xf32>, vector<256x256xf32>, vector<4x256xf32> -> vector<4x256xf32>
    %6 = arith.subf %3, %5 : vector<4x256xf32>
    %7 = arith.mulf %6, %6 : vector<4x256xf32>
    %cst_7 = arith.constant dense<0.000000e+00> : vector<4x256xf32>
    %8 = tpu.matmul %7, %4, %cst_7 {dimension_numbers = #tpu.dot_dimension_numbers<[1], [0], [0], [1], [0, 0, 1, 1], [], []>} : vector<4x256xf32>, vector<256x256xf32>, vector<4x256xf32> -> vector<4x256xf32>
    %cst_8 = arith.constant 9.99999974E-6 : f32
    %9 = vector.broadcast %cst_8 : f32 to vector<4x256xf32>
    %10 = arith.addf %8, %9 : vector<4x256xf32>
    %11 = math.rsqrt %10 : vector<4x256xf32>
    %12 = arith.mulf %6, %11 : vector<4x256xf32>
    %cst_9 = arith.constant 0.000000e+00 : f32
    %13 = vector.broadcast %cst_9 : f32 to vector<4x256xf32>
    %14 = arith.maximumf %12, %13 : vector<4x256xf32>
    %c0_10 = arith.constant 0 : index
    %c0_11 = arith.constant 0 : index
    %c0_12 = arith.constant 0 : index
    %15 = vector.load %arg4[%c0_10, %c0_11, %c0_12] : memref<1x4x256xf32, #tpu.memory_space<vmem>>, vector<1x4x256xf32>
    %16 = vector.shape_cast %15 : vector<1x4x256xf32> to vector<4x256xf32>
    %17 = vector.shape_cast %14 : vector<4x256xf32> to vector<1x4x256xf32>
    tpu.vector_store %arg4[%c0_10, %c0_11, %c0_12], %17 {strides = array<i32>} : memref<1x4x256xf32, #tpu.memory_space<vmem>>, vector<1x4x256xf32>,
    return
  }
  func.func @transform_0(%arg0: i32) -> (i32, i32, i32) {
    %c0_i32 = arith.constant 0 : i32
    %c0_i32_0 = arith.constant 0 : i32
    %c0_i32_1 = arith.constant 0 : i32
    return %arg0, %c0_i32, %c0_i32_0 : i32, i32, i32
  }
  func.func @transform_1(%arg0: i32) -> (i32, i32) {
    %c0_i32 = arith.constant 0 : i32
    %c0_i32_0 = arith.constant 0 : i32
    %c0_i32_1 = arith.constant 0 : i32
    return %c0_i32, %c0_i32_0 : i32, i32
  }
  func.func @transform_2(%arg0: i32) -> (i32, i32) {
    %c0_i32 = arith.constant 0 : i32
    %c0_i32_0 = arith.constant 0 : i32
    %c0_i32_1 = arith.constant 0 : i32
    return %c0_i32, %c0_i32_0 : i32, i32
  }
  func.func @transform_3(%arg0: i32) -> (i32, i32, i32) {
    %c0_i32 = arith.constant 0 : i32
    %c0_i32_0 = arith.constant 0 : i32
    %c0_i32_1 = arith.constant 0 : i32
    return %arg0, %c0_i32, %c0_i32_0 : i32, i32, i32
  }
}

</mosaic_0001>

<bundles_post_ra>
// kernel: tpu_custom_call.1
= control target key start
LH: loop header
LB: loop body
LE: loop exit
PB: predicated region body
PF: predicated region fallthrough
CT: control target
= control target key end

     0   :  { %8 = vsyncpa [#allocation3], 0  ;;  %s1147_s0 = inlined_call_operand.vmem [shape: f32[2,36,256], index: 0, kind: input, shape index: {}]   ;;  %s1148_s1 = inlined_call_operand.vmem [shape: f32[4,36], index: 1, kind: input, shape index: {}]   ;;  %s1149_s2 = inlined_call_operand.hbm [shape: f32[256,256], index: 2, kind: input, shape index: {}]   ;;  %s1150_s3 = inlined_call_operand.hbm [shape: f32[2,4,256], index: 3, kind: output, shape index: {}]  }
   0x1   :  { %9 = vsyncpa [#allocation4], 0 }
   0x2   :  { %11 = vsyncpa [#allocation4 + $0x1], 0  ;;  %s790_s12 = smov 0   ;;  %s792_s13 = smov 0  }
   0x3   :  { %s794_s14 = smov 0   ;;  %s796_s15 = smov 0  }
   0x4 LB: > { %s811_s16 = sadd.s32 4294967295, %s765_s15   ;;  %s594_s17 = sadd.s32 4294967294, %s765_s15   ;;  %s765_s15 = sphi %s796_s15, %s1156_s15   ;;  %s761_s14 = sphi %s794_s14, %s1155_s14   ;;  %s757_s13 = sphi %s792_s13, %s1154_s13   ;;  %s753_s12 = sphi %s790_s12, %s1153_s12  }
   0x5   : > { %s815_s18 = sadd.s32 1, %s765_s15   ;;  %s92_s19 = sadd.s32 1, %s761_s14 }
   0x6   : > { %s89_s20 = ssub.s32 %s765_s15, %s815_s18  ;;  %p102_p0 = scmp.ne.s32.totalorder %s761_s14, %s757_s13 }
   0x7   : > { %p90_p1 = scmp.eq.s32.totalorder %s89_s20, 0  ;;  %p103_p2 = scmp.eq.s32.totalorder %s811_s16, 1 }
   0x8   : > { %p108_p3 = scmp.ne.s32.totalorder %s757_s13, %s753_s12  ;;  %p109_p4 = scmp.eq.s32.totalorder %s594_s17, 1 }
   0x9   : > { %s826_s21 = scalar_select %p90_p1, %s761_s14, %s92_s19  }
   0xa   : > { %p828_p5 = por %p103_p2, %p102_p0  ;;  %p832_p6 = por %p109_p4, %p108_p3 }
   0xb   : > { %p595_p7 = scmp.ge.s32.totalorder %s765_s15, 1  ;;  %p116_p8 = scmp.lt.s32.totalorder %s765_s15, 3 }
   0xc   : > { %p627_p9 = scmp.eq.s32.totalorder %s811_s16, 0  ;;  %s130_s26 = sshll.u32 %s1149_s2, 4  ;;  %s131_s26 = int_to_ptr.hbm [resolvable:$true] %s130_s26 }
   0xd   : > { %p117_p10 = pnand %p595_p7, %p116_p8  ;;  %s767_s27 = smov [#allocation2]  }
   0xe   : > { %s132_s28 = sshll.u32 %s767_s27, 4  ;;  %s768_s29 = smov 256   ;;  %s133_s28 = int_to_ptr.vmem [resolvable:$true] %s132_s28 }
   0xf   : > { %p619_p11 = pneg %p117_p10  ;;  %s769_s30 = smov 16  }
  0x10   : > { %156 = sbr.rel (%p117_p10) target bundleno = 465 (0x1d1), region = 32 }
  0x11   : > { %p620_p12 = pnand %p627_p9, %p619_p11 }
  0x13   : > { %622 = dma.hbm_to_vmem [thread:$0]  (!%p620_p12), %s131_s26, 8192, %s133_s28, [#allocation3], %s768_s29, %s768_s29, %s769_s30  }
  0x15   : > { %744 = dma.done.wait (%p627_p9), [#allocation3], 8192  }
  0x16   : > { %746 = vsyncadd (%p627_p9), [#allocation3], 4294959104  ;;  %p181_p13 = scmp.lt.s32.totalorder %s811_s16, 1  ;;  %vm201_vm0 = vcmask 1043456   ;;  %v855_v6 = vld [vmem:[#allocation2 + $0xf0] sm:$0xff]  ;;  %v860_v10 = vld [vmem:[#allocation2 + $0xe0] sm:$0xff] }
  0x17   : > { %312 = vmatpush.msra.mxu2 %v855_v6  ;;  %v858_v9 = vld [vmem:[#allocation2 + $0x1f0] sm:$0xff]  ;;  %v862_v11 = vld [vmem:[#allocation2 + $0x1e0] sm:$0xff]  ;;  %vm197_vm1 = vcmask 293888   ;;  %v871_v16 = vld [vmem:[#allocation2 + $0xf8] sm:$0xff]  ;;  %s178_s11 = sand.u32 1, %s757_s13   ;;  %s611_s19 = sshll.u32 %s811_s16, 3 }
  0x18   : > { %s182_s4 = scalar_select %p181_p13, %s811_s16, 1  ;;  %332 = vmatpush.msra.mxu3 %v858_v9  ;;  %v866_v14 = vld [vmem:[#allocation2 + $0xd0] sm:$0xff]  ;;  %v186_v15 = vld [vmem:[%s1148_s1] sm:$0xf]  ;;  %v873_v17 = vld [vmem:[#allocation2 + $0x1f8] sm:$0xff] }
  0x19   : > { %313 = vmatpush.msra.mxu2 %v860_v10  ;;  %v877_v18 = vld [vmem:[#allocation2 + $0x1d0] sm:$0xff]  ;;  %v879_v19 = vld [vmem:[#allocation2 + $0xc0] sm:$0xff]  ;;  %v881_v20 = vld [vmem:[#allocation2 + $0xe8] sm:$0xff]  ;;  %s600_s17 = sshll.u32 %s178_s11, 3  ;;  %s518_s25 = scalar_lea.hbm %s1150_s3, %s611_s19 }
  0x1a   : > { %s612_s5 = smul.u32 80, %s182_s4  ;;  %333 = vmatpush.msra.mxu3 %v862_v11  ;;  %v883_v21 = vld [vmem:[#allocation2 + $0x1e8] sm:$0xff]  ;;  %v887_v22 = vld [vmem:[#allocation2 + $0x1c0] sm:$0xff]  ;;  %v889_v23 = vld [vmem:[#allocation2 + $0xb0] sm:$0xff]  ;;  %s180_s26 = scalar_lea.vmem [#allocation5], %s600_s17 }
  0x1b   : > { %314 = vmatpush.msra.mxu2 %v866_v14  ;;  %v892_v24 = vld [vmem:[#allocation2 + $0xd8] sm:$0xff]  ;;  %v899_v26 = vld [vmem:[#allocation2 + $0x1b0] sm:$0xff]  ;;  %v901_v27 = vld [vmem:[#allocation2 + $0xa0] sm:$0xff]  ;;  %s520_s27 = sshll.u32 %s180_s26, 4  ;;  %s522_s28 = sshll.u32 %s518_s25, 4  ;;  %s521_s27 = int_to_ptr.vmem [resolvable:$true] %s520_s27  ;;  %s523_s28 = int_to_ptr.hbm [resolvable:$true] %s522_s28 }
  0x1c   : > { %s185_s8 = scalar_lea.vmem %s1147_s0, %s612_s5  ;;  %334 = vmatpush.msra.mxu3 %v877_v18  ;;  %v894_v25 = vld [vmem:[#allocation2 + $0x1d8] sm:$0xff]  ;;  %v904_v28 = vld [vmem:[#allocation2 + $0xc8] sm:$0xff]  ;;  %v911_v30 = vld [vmem:[#allocation2 + $0x1a0] sm:$0xff]  ;;  %s507_s16 = scalar_lea.sflag [#allocation4], %s178_s11 }
  0x1d   : > { %v195_v0 = vld [vmem:[%s185_s8 + $0x40] sm:$0xf]  ;;  %v196_v1 = vld [vmem:[%s185_s8 + $0x48] sm:$0xf]  ;;  %v193_v2 = vld [vmem:[%s185_s8 + $0x30] sm:$0xff]  ;;  %315 = vmatpush.msra.mxu2 %v879_v19  ;;  %s713_s29 = sshra.s32 %s523_s28, 4  ;;  %s714_s29 = int_to_ptr.hbm [resolvable:$true] %s713_s29 }
  0x1e   : > { %602 = vmatpush.msk.msra.mxu0 %vm201_vm0, %v195_v0  ;;  %604 = vmatpush.msk.msra.mxu1 %vm201_vm0, %v196_v1  ;;  %v194_v3 = vld [vmem:[%s185_s8 + $0x38] sm:$0xff]  ;;  %v191_v4 = vld [vmem:[%s185_s8 + $0x20] sm:$0xff]  ;;  %v192_v5 = vld [vmem:[%s185_s8 + $0x28] sm:$0xff]  ;;  %s715_s30 = scalar_lea.hbm %s714_s29, 8  ;;  %s719_s6 = scalar_lea.hbm %s1150_s3, 16 }
  0x1f   : > { %v189_v7 = vld [vmem:[%s185_s8 + $0x10] sm:$0xff]  ;;  %v190_v8 = vld [vmem:[%s185_s8 + $0x18] sm:$0xff]  ;;  %v187_v12 = vld [vmem:[%s185_s8] sm:$0xff]  ;;  %335 = vmatpush.msra.mxu3 %v887_v22  ;;  %316 = vmatpush.msra.mxu2 %v889_v23  ;;  %p716_p0 = scmp.ne.s32.totalorder %s714_s29, %s715_s30  ;;  %p720_p3 = scmp.lt.s32.totalorder %s714_s29, %s1150_s3 }
  0x20   : > { %220 = vmatpush.msra.mxu0 %v193_v2  ;;  %240 = vmatpush.msra.mxu1 %v194_v3  ;;  %v188_v13 = vld [vmem:[%s185_s8 + $0x8] sm:$0xff]  ;;  %v913_v31 = vld [vmem:[#allocation2 + $0x90] sm:$0xff]  ;;  %v916_v32 = vld [vmem:[#allocation2 + $0xb8] sm:$0xff]  ;;  %p721_p4 = scmp.lt.s32.totalorder %s719_s6, %s715_s30 }
  0x21   : > { %v906_v29 = vld [vmem:[#allocation2 + $0x1c8] sm:$0xff]  ;;  %336 = vmatpush.msra.mxu3 %v899_v26  ;;  %v918_v33 = vld [vmem:[#allocation2 + $0x1b8] sm:$0xff]  ;;  %317 = vmatpush.msra.mxu2 %v901_v27  ;;  %v923_v34 = vld [vmem:[#allocation2 + $0x190] sm:$0xff]  ;;  %p717_p1 = pnand %p716_p0, %p828_p5 }
  0x22   : > { %221 = vmatpush.msra.mxu0 %v191_v4  ;;  %241 = vmatpush.msra.mxu1 %v192_v5  ;;  %v925_v35 = vld [vmem:[#allocation2 + $0x80] sm:$0xff]  ;;  %v928_v36 = vld [vmem:[#allocation2 + $0xa8] sm:$0xff]  ;;  %v937_v39 = vld [vmem:[#allocation2 + $0x70] sm:$0xff]  ;;  %p722_p7 = por %p721_p4, %p720_p3 }
  0x23   : > { %337 = vmatpush.msra.mxu3 %v911_v30  ;;  %v930_v37 = vld [vmem:[#allocation2 + $0x1a8] sm:$0xff]  ;;  %318 = vmatpush.msra.mxu2 %v913_v31  ;;  %v935_v38 = vld [vmem:[#allocation2 + $0x180] sm:$0xff]  ;;  %v940_v40 = vld [vmem:[#allocation2 + $0x98] sm:$0xff]  ;;  %p718_p2 = pneg %p717_p1 }
  0x24   : > { %222 = vmatpush.msra.mxu0 %v189_v7  ;;  %242 = vmatpush.msra.mxu1 %v190_v8  ;;  %v942_v41 = vld [vmem:[#allocation2 + $0x198] sm:$0xff]  ;;  %v947_v42 = vld [vmem:[#allocation2 + $0x170] sm:$0xff]  ;;  %v949_v43 = vld [vmem:[#allocation2 + $0x60] sm:$0xff] }
  0x25   : > { %338 = vmatpush.msra.mxu3 %v923_v34  ;;  %319 = vmatpush.msra.mxu2 %v925_v35  ;;  %v952_v44 = vld [vmem:[#allocation2 + $0x88] sm:$0xff]  ;;  %v959_v46 = vld [vmem:[#allocation2 + $0x160] sm:$0xff]  ;;  %v961_v47 = vld [vmem:[#allocation2 + $0x50] sm:$0xff]  ;;  %p723_p8 = pnand %p722_p7, %p718_p2 }
  0x26   : > { %223 = vmatpush.msra.mxu0 %v187_v12  ;;  %243 = vmatpush.msra.mxu1 %v188_v13  ;;  %v954_v45 = vld [vmem:[#allocation2 + $0x188] sm:$0xff]  ;;  %v964_v48 = vld [vmem:[#allocation2 + $0x78] sm:$0xff]  ;;  %v971_v50 = vld [vmem:[#allocation2 + $0x150] sm:$0xff] }
  0x27   : > { %603 = vmatmul.msk.f32.vlgmr.msra.gmra.mxu0 %vm197_vm1, %v186_v15  ;;  %605 = vmatmul.msk.f32.vlgmr.msra.gmra.mxu1 %vm197_vm1, %v186_v15  ;;  %v966_v49 = vld [vmem:[#allocation2 + $0x178] sm:$0xff]  ;;  %v973_v51 = vld [vmem:[#allocation2 + $0x40] sm:$0xff]  ;;  %v976_v52 = vld [vmem:[#allocation2 + $0x68] sm:$0xff] }
  0x28   : > { %352 = vmatpush.msrb.mxu0 %v871_v16  ;;  %372 = vmatpush.msrb.mxu1 %v873_v17  ;;  %v978_v53 = vld [vmem:[#allocation2 + $0x168] sm:$0xff]  ;;  %v983_v54 = vld [vmem:[#allocation2 + $0x140] sm:$0xff]  ;;  %v985_v55 = vld [vmem:[#allocation2 + $0x30] sm:$0xff] }
  0x29   : > { %339 = vmatpush.msra.mxu3 %v935_v38  ;;  %320 = vmatpush.msra.mxu2 %v937_v39  ;;  %v988_v56 = vld [vmem:[#allocation2 + $0x58] sm:$0xff]  ;;  %v995_v58 = vld [vmem:[#allocation2 + $0x130] sm:$0xff]  ;;  %v997_v59 = vld [vmem:[#allocation2 + $0x20] sm:$0xff] }
  0x2a   : > { %353 = vmatpush.msrb.mxu0 %v881_v20  ;;  %373 = vmatpush.msrb.mxu1 %v883_v21  ;;  %v990_v57 = vld [vmem:[#allocation2 + $0x158] sm:$0xff]  ;;  %v1000_v60 = vld [vmem:[#allocation2 + $0x48] sm:$0xff]  ;;  %v1007_v62 = vld [vmem:[#allocation2 + $0x120] sm:$0xff] }
  0x2b   : > { %340 = vmatpush.msra.mxu3 %v947_v42  ;;  %321 = vmatpush.msra.mxu2 %v949_v43  ;;  %v1002_v61 = vld [vmem:[#allocation2 + $0x148] sm:$0xff]  ;;  %v1009_v63 = vld [vmem:[#allocation2 + $0x10] sm:$0xff]  ;;  %v1012_v0 = vld [vmem:[#allocation2 + $0x38] sm:$0xff] }
  0x2c   : > { %354 = vmatpush.msrb.mxu0 %v892_v24  ;;  %374 = vmatpush.msrb.mxu1 %v894_v25  ;;  %v1014_v1 = vld [vmem:[#allocation2 + $0x138] sm:$0xff]  ;;  %v1019_v2 = vld [vmem:[#allocation2 + $0x110] sm:$0xff]  ;;  %v1022_v3 = vld [vmem:[#allocation2 + $0x28] sm:$0xff] }
  0x2d   : > { %341 = vmatpush.msra.mxu3 %v959_v46  ;;  %322 = vmatpush.msra.mxu2 %v961_v47  ;;  %v1024_v4 = vld [vmem:[#allocation2 + $0x128] sm:$0xff]  ;;  %v1030_v5 = vld [vmem:[#allocation2 + $0x18] sm:$0xff]  ;;  %v1038_v8 = vld [vmem:[#allocation2] sm:$0xff] }
  0x2e   : > { %355 = vmatpush.msrb.mxu0 %v904_v28  ;;  %375 = vmatpush.msrb.mxu1 %v906_v29  ;;  %v1032_v7 = vld [vmem:[#allocation2 + $0x118] sm:$0xff]  ;;  %v1040_v12 = vld [vmem:[#allocation2 + $0x100] sm:$0xff]  ;;  %v1042_v13 = vld [vmem:[#allocation2 + $0x8] sm:$0xff] }
  0x2f   : > { %342 = vmatpush.msra.mxu3 %v971_v50  ;;  %323 = vmatpush.msra.mxu2 %v973_v51  ;;  %v1046_v15 = vld [vmem:[#allocation2 + $0x108] sm:$0xff] }
  0x30   : > { %356 = vmatpush.msrb.mxu0 %v916_v32  ;;  %376 = vmatpush.msrb.mxu1 %v918_v33 }
  0x31   : > { %343 = vmatpush.msra.mxu3 %v983_v54  ;;  %324 = vmatpush.msra.mxu2 %v985_v55 }
  0x32   : > { %357 = vmatpush.msrb.mxu0 %v928_v36  ;;  %377 = vmatpush.msrb.mxu1 %v930_v37 }
  0x33   : > { %344 = vmatpush.msra.mxu3 %v995_v58  ;;  %325 = vmatpush.msra.mxu2 %v997_v59 }
  0x34   : > { %358 = vmatpush.msrb.mxu0 %v940_v40  ;;  %378 = vmatpush.msrb.mxu1 %v942_v41 }
  0x35   : > { %345 = vmatpush.msra.mxu3 %v1007_v62  ;;  %326 = vmatpush.msra.mxu2 %v1009_v63 }
  0x36   : > { %359 = vmatpush.msrb.mxu0 %v952_v44  ;;  %379 = vmatpush.msrb.mxu1 %v954_v45 }
  0x37   : > { %346 = vmatpush.msra.mxu3 %v1019_v2  ;;  %327 = vmatpush.msra.mxu2 %v1038_v8 }
  0x38   : > { %360 = vmatpush.msrb.mxu0 %v964_v48  ;;  %380 = vmatpush.msrb.mxu1 %v966_v49 }
  0x39   : > { %347 = vmatpush.msra.mxu3 %v1040_v12  ;;  %396 = vmatpush.msrb.mxu2 %v855_v6 }
  0x3a   : > { %361 = vmatpush.msrb.mxu0 %v976_v52  ;;  %381 = vmatpush.msrb.mxu1 %v978_v53 }
  0x3b   : > { %416 = vmatpush.msrb.mxu3 %v858_v9  ;;  %397 = vmatpush.msrb.mxu2 %v860_v10 }
  0x3c   : > { %362 = vmatpush.msrb.mxu0 %v988_v56  ;;  %382 = vmatpush.msrb.mxu1 %v990_v57 }
  0x3d   : > { %417 = vmatpush.msrb.mxu3 %v862_v11  ;;  %398 = vmatpush.msrb.mxu2 %v866_v14 }
  0x3e   : > { %363 = vmatpush.msrb.mxu0 %v1000_v60  ;;  %383 = vmatpush.msrb.mxu1 %v1002_v61 }
  0x3f   : > { %418 = vmatpush.msrb.mxu3 %v877_v18  ;;  %399 = vmatpush.msrb.mxu2 %v879_v19 }
  0x40   : > { %364 = vmatpush.msrb.mxu0 %v1012_v0  ;;  %384 = vmatpush.msrb.mxu1 %v1014_v1 }
  0x41   : > { %419 = vmatpush.msrb.mxu3 %v887_v22  ;;  %400 = vmatpush.msrb.mxu2 %v889_v23 }
  0x42   : > { %365 = vmatpush.msrb.mxu0 %v1022_v3  ;;  %385 = vmatpush.msrb.mxu1 %v1024_v4 }
  0x43   : > { %420 = vmatpush.msrb.mxu3 %v899_v26  ;;  %401 = vmatpush.msrb.mxu2 %v901_v27 }
  0x44   : > { %366 = vmatpush.msrb.mxu0 %v1030_v5  ;;  %386 = vmatpush.msrb.mxu1 %v1032_v7 }
  0x45   : > { %421 = vmatpush.msrb.mxu3 %v911_v30  ;;  %402 = vmatpush.msrb.mxu2 %v913_v31 }
  0x46   : > { %367 = vmatpush.msrb.mxu0 %v1042_v13  ;;  %387 = vmatpush.msrb.mxu1 %v1046_v15 }
  0x47   : > { %422 = vmatpush.msrb.mxu3 %v923_v34  ;;  %403 = vmatpush.msrb.mxu2 %v925_v35 }
  0x48   : > { %456 = vmatpush.msra.mxu1 %v873_v17  ;;  %436 = vmatpush.msra.mxu0 %v871_v16 }
  0x49   : > { %423 = vmatpush.msrb.mxu3 %v935_v38  ;;  %404 = vmatpush.msrb.mxu2 %v937_v39 }
  0x4a   : > { %457 = vmatpush.msra.mxu1 %v883_v21  ;;  %437 = vmatpush.msra.mxu0 %v881_v20 }
  0x4b   : > { %424 = vmatpush.msrb.mxu3 %v947_v42  ;;  %405 = vmatpush.msrb.mxu2 %v949_v43 }
  0x4c   : > { %458 = vmatpush.msra.mxu1 %v894_v25  ;;  %438 = vmatpush.msra.mxu0 %v892_v24 }
  0x4d   : > { %425 = vmatpush.msrb.mxu3 %v959_v46  ;;  %406 = vmatpush.msrb.mxu2 %v961_v47 }
  0x4e   : > { %459 = vmatpush.msra.mxu1 %v906_v29  ;;  %439 = vmatpush.msra.mxu0 %v904_v28 }
  0x4f   : > { %426 = vmatpush.msrb.mxu3 %v971_v50  ;;  %407 = vmatpush.msrb.mxu2 %v973_v51 }
  0x50   : > { %460 = vmatpush.msra.mxu1 %v918_v33  ;;  %440 = vmatpush.msra.mxu0 %v916_v32 }
  0x51   : > { %427 = vmatpush.msrb.mxu3 %v983_v54  ;;  %408 = vmatpush.msrb.mxu2 %v985_v55 }
  0x52   : > { %461 = vmatpush.msra.mxu1 %v930_v37  ;;  %441 = vmatpush.msra.mxu0 %v928_v36 }
  0x53   : > { %428 = vmatpush.msrb.mxu3 %v995_v58  ;;  %409 = vmatpush.msrb.mxu2 %v997_v59 }
  0x54   : > { %462 = vmatpush.msra.mxu1 %v942_v41  ;;  %442 = vmatpush.msra.mxu0 %v940_v40 }
  0x55   : > { %429 = vmatpush.msrb.mxu3 %v1007_v62  ;;  %410 = vmatpush.msrb.mxu2 %v1009_v63 }
  0x56   : > { %463 = vmatpush.msra.mxu1 %v954_v45  ;;  %443 = vmatpush.msra.mxu0 %v952_v44 }
  0x57   : > { %430 = vmatpush.msrb.mxu3 %v1019_v2  ;;  %411 = vmatpush.msrb.mxu2 %v1038_v8 }
  0x58   : > { %464 = vmatpush.msra.mxu1 %v966_v49  ;;  %444 = vmatpush.msra.mxu0 %v964_v48 }
  0x59   : > { %431 = vmatpush.msrb.mxu3 %v1040_v12 }
  0x5a   : > { %465 = vmatpush.msra.mxu1 %v978_v53  ;;  %445 = vmatpush.msra.mxu0 %v976_v52 }
  0x5c   : > { %466 = vmatpush.msra.mxu1 %v990_v57  ;;  %446 = vmatpush.msra.mxu0 %v988_v56 }
  0x5e   : > { %467 = vmatpush.msra.mxu1 %v1002_v61  ;;  %447 = vmatpush.msra.mxu0 %v1000_v60 }
  0x60   : > { %468 = vmatpush.msra.mxu1 %v1014_v1  ;;  %448 = vmatpush.msra.mxu0 %v1012_v0 }
  0x62   : > { %469 = vmatpush.msra.mxu1 %v1024_v4  ;;  %449 = vmatpush.msra.mxu0 %v1022_v3 }
  0x64   : > { %470 = vmatpush.msra.mxu1 %v1032_v7  ;;  %450 = vmatpush.msra.mxu0 %v1030_v5 }
  0x66   : > { %471 = vmatpush.msra.mxu1 %v1046_v15  ;;  %451 = vmatpush.msra.mxu0 %v1042_v13 }
  0xa4   : > { %v225_v6 = vpop.f32.mrf.mxu0  ;;  %v245_v9 = vpop.f32.mrf.mxu1 }
  0xa5   : > { %328 = vmatmul.f32.vlgmr.msra.gmra.mxu2 %v225_v6  ;;  %348 = vmatmul.f32.vlgmr.msra.gmra.mxu3 %v245_v9 }
  0xa6   : > { %368 = vmatmul.f32.vlgmr.msrb.gmra.mxu0 %v225_v6  ;;  %388 = vmatmul.f32.vlgmr.msrb.gmra.mxu1 %v245_v9 }
 0x123   : > { %v369_v10 = vpop.f32.mrf.mxu0  ;;  %v389_v11 = vpop.f32.mrf.mxu1 }
 0x124   : > { %v390_v14 = vadd.f32 %v389_v11, %v369_v10 }
 0x126   : > { %v393_v16 = vsub.f32 %v245_v9, %v390_v14 }
 0x128   : > { %v329_v17 = vpop.f32.mrf.mxu2  ;;  %v349_v18 = vpop.f32.mrf.mxu3  ;;  %v395_v19 = vmul.f32 %v393_v16, %v393_v16 }
 0x129   : > { %v350_v20 = vadd.f32 %v349_v18, %v329_v17 }
 0x12a   : > { %432 = vmatmul.f32.vlgmr.msrb.gmra.mxu3 %v395_v19  ;;  %472 = vmatmul.f32.vlgmr.msra.gmra.mxu1 %v395_v19 }
 0x12b   : > { %v392_v21 = vsub.f32 %v225_v6, %v350_v20 }
 0x12d   : > { %v394_v22 = vmul.f32 %v392_v21, %v392_v21 }
 0x12f   : > { %412 = vmatmul.f32.vlgmr.msrb.gmra.mxu2 %v394_v22  ;;  %452 = vmatmul.f32.vlgmr.msra.gmra.mxu0 %v394_v22 }
 0x1a7   : > { %v473_v25 = vpop.f32.mrf.mxu1 }
 0x1ac   : > { %v453_v23 = vpop.f32.mrf.mxu0 }
 0x1ad   : > { %v454_v24 = vadd.f32 1e-05, %v453_v23  ;;  %v433_v29 = vpop.f32.mrf.mxu3 }
 0x1af   : > { %v474_v26 = vadd.f32 %v473_v25, %v454_v24 }
 0x1b1   : > { %665 = vrsqrt.f32 %v474_v26  ;;  %vm492_vm3 = vweird.f32 %v474_v26 }
 0x1b2   : > { %v413_v27 = vpop.f32.mrf.mxu2 }
 0x1b3   : > { %v414_v28 = vadd.f32 1e-05, %v413_v27 }
 0x1b5   : > { %v434_v30 = vadd.f32 %v433_v29, %v414_v28 }
 0x1b7   : > { %v666_v31 = vpop.eup %665  ;;  %667 = vrsqrt.f32 %v434_v30  ;;  %vm482_vm6 = vweird.f32 %v434_v30 }
 0x1b8   : > { %v487_v32 = vmul.f32 %v666_v31, %v474_v26  ;;  %vm493_vm2 = vweird.f32 %v666_v31 }
 0x1b9   : > { %vm494_vm4 = vmor %vm492_vm3, %vm493_vm2 }
 0x1ba   : > { %v488_v33 = vmul.f32 %v666_v31, %v487_v32 }
 0x1bc   : > { %v489_v34 = vmul.f32 0.5, %v488_v33 }
 0x1bd   : > { %v668_v35 = vpop.eup %667 }
 0x1be   : > { %v490_v36 = vsub.f32 1.5, %v489_v34  ;;  %v477_v37 = vmul.f32 %v668_v35, %v434_v30  ;;  %vm483_vm5 = vweird.f32 %v668_v35 }
 0x1bf   : > { %vm484_vm7 = vmor %vm482_vm6, %vm483_vm5 }
 0x1c0   : > { %v491_v38 = vmul.f32 %v666_v31, %v490_v36  ;;  %v478_v39 = vmul.f32 %v668_v35, %v477_v37 }
 0x1c2   : > { %v495_v40 = vsel %vm494_vm4, %v666_v31, %v491_v38  ;;  %v479_v41 = vmul.f32 0.5, %v478_v39 }
 0x1c3   : > { %v497_v42 = vmul.f32 %v495_v40, %v393_v16 }
 0x1c4   : > { %v480_v43 = vsub.f32 1.5, %v479_v41 }
 0x1c5   : > { %v499_v45 = vmax.f32 %v497_v42, 0.0 }
 0x1c6   : > { %v481_v44 = vmul.f32 %v668_v35, %v480_v43 }
 0x1c7   : > { %v502_v48 = vrot.slane %v499_v45, 4 }
 0x1c8   : > { %v485_v46 = vsel %vm484_vm7, %v668_v35, %v481_v44 }
 0x1c9   : > { %v496_v47 = vmul.f32 %v485_v46, %v392_v21 }
 0x1cb   : > { %v498_v49 = vmax.f32 %v496_v47, 0.0 }
 0x1cd   : > { %v503_v50 = vsel %vm201_vm0, %v498_v49, %v502_v48 }
 0x1ce   : > { %505 = vst [vmem:[%s180_s26] sm:$0xff] %v503_v50 }
 0x1cf   : > { %726 = shalt.err (!%p723_p8)
}
 0x1d0   : > { %617 = dma.vmem_to_hbm [thread:$0]  (%p828_p5), %s521_s27, 128, %s523_s28, %s507_s16  }
 0x1d1 PF: > { %p629_p9 = scmp.ge.s32.totalorder %s765_s15, 2  ;;  %s534_s9 = sand.u32 1, %s753_s12  }
 0x1d2   : > { %s535_s10 = scalar_lea.sflag [#allocation4], %s534_s9 }
 0x1d3   : > { %p624_p10 = pnand %p629_p9, %p832_p6 }
 0x1d5   : > { %p625_p11 = pneg %p624_p10 }
 0x1d7   : > { %748 = dma.done.wait (%p625_p11), %s535_s10, 128  }
 0x1d8   : > { %750 = vsyncadd (%p625_p11), %s535_s10, 4294967168  ;;  %p14_p12 = scmp.ge.s32.totalorder %s815_s18, 4   ;;  %s1153_s12 = smov %s757_s13 }
 0x1d9   : > { %s1154_s13 = smov %s761_s14  ;;  %s1155_s14 = smov %s826_s21 }
 0x1da   : > { %s1156_s15 = smov %s815_s18  ;;  %16 = sbr.rel (!%p14_p12) target bundleno = 4 (0x4), region = 72 }
 0x1df   :  { %541 = vsyncpa [#allocation3], 1 }
 0x1e0   :  { %543 = vsyncpa [#allocation3 + $0x1], 1 }
 0x1e1   :  { %544 = vsyncpa [#allocation4], 1 }
 0x1e2   :  { %546 = vsyncpa [#allocation4 + $0x1], 1 }

</bundles_post_ra>
